<compile_context>
chip_gen: v6e
topology: v6e:2x2x1
jax: 0.10.0
libtpu: 0.0.40
codegen_flags: <defaults>
</compile_context>

<pallas_src>
import functools

import jax
import jax.numpy as jnp
from jax.experimental import pallas as pl
from jax.experimental.pallas import tpu as pltpu

LANES = 128
MAX_TILE_ROWS = 8192   # 8192*128*4B = 4 MiB per f32 input per pipeline buffer
NUM_CORES = 2          # leading "parallel" grid axis (sharded on multi-TC chips)


def _round_up(x, m):
    return ((x + m - 1) // m) * m


def _sublane_mult(dtype):
    # Minimum sublane multiple for the dtype's packing (f32:8, bf16:16, int8:32).
    return {4: 8, 2: 16, 1: 32}.get(jnp.dtype(dtype).itemsize, 8)


def _focal_kernel(pred_ref, gt_ref, out_ref, acc_ref, *,
                  gamma, alpha, rows, tile_rows, blocks_per_core,
                  acc_rows, apply_mask):
    c = pl.program_id(0)   # core axis ("parallel")
    i = pl.program_id(1)   # streaming axis ("arbitrary")

    @pl.when(i == 0)
    def _():
        acc_ref[...] = jnp.zeros_like(acc_ref)

    p = pred_ref[...].astype(jnp.float32)
    g = gt_ref[...]
    one_minus_p = 1.0 - p
    is_pos = g != 0

    # Focal weight: select the base first, then one pow (a multiply for gamma=2).
    base = jnp.where(is_pos, one_minus_p, p)
    if float(gamma) == 2.0:
        w = base * base
    elif float(gamma).is_integer() and float(gamma) > 0:
        w = base ** int(gamma)
    else:
        w = base ** jnp.float32(gamma)

    # Single log per element: select the log argument, not the log result.
    # The selects also keep 0 * inf out of the selected branch.
    coef = jnp.where(is_pos, jnp.float32(-alpha), jnp.float32(-(1.0 - alpha)))
    log_arg = jnp.where(is_pos, p, one_minus_p)
    l = coef * w * jnp.log(log_arg)

    if apply_mask:
        # Row-only validity mask (padded lanes are already exactly zero loss
        # because the wrapper pads pred with 0 and gt with 0).  Also zeroes
        # garbage from partial / fully-out-of-range edge blocks.
        row_ids = jax.lax.broadcasted_iota(jnp.int32, (tile_rows, LANES), 0)
        global_row = (c * blocks_per_core + i) * tile_rows + row_ids
        l = jnp.where(global_row < rows, l, jnp.float32(0.0))

    # Fold the tile into a resident (acc_rows, 128) accumulator with pure
    # elementwise VPU adds (acc_rows is a multiple of 8, so the reshape does
    # not cross (8, 128) tile boundaries).  Wider acc -> interleaved partials.
    acc_ref[...] += jnp.sum(
        l.reshape(tile_rows // acc_rows, acc_rows, LANES), axis=0)

    @pl.when(i == pl.num_programs(1) - 1)
    def _():
        # Expensive cross-lane reduction happens exactly once per core.
        out_ref[0, 0] = jnp.sum(acc_ref[...])


def focal_loss(pred, gt, mean=True, gamma=2.0, alpha=0.75):
    assert pred.shape == gt.shape

    # Accept bf16 pred / int8 gt (etc.) directly: no wrapper-side cast pass,
    # the (cheap) cast to f32 happens in-kernel.  Bool labels are promoted to
    # int8 (same byte width) to keep the VMEM load simple.
    if gt.dtype == jnp.bool_:
        gt = gt.astype(jnp.int8)

    n_valid = pred.size
    pred_flat = pred.reshape(-1)
    gt_flat = gt.reshape(-1)

    # Pad only when the element count is not a multiple of 128 lanes.
    # Padding with pred=0, gt=0 yields exactly zero loss for padded lanes:
    #   -(1-alpha) * 0**gamma * log(1 - 0) == 0
    rem = n_valid % LANES
    if rem:
        pad = LANES - rem
        pred_flat = jnp.pad(pred_flat, (0, pad))
        gt_flat = jnp.pad(gt_flat, (0, pad))

    rows = pred_flat.size // LANES
    pred2d = pred_flat.reshape(rows, LANES)
    gt2d = gt_flat.reshape(rows, LANES)

    # Tile rows: as large as possible, multiple of the strictest dtype packing.
    rmult = max(_sublane_mult(pred2d.dtype), _sublane_mult(gt2d.dtype))
    tile_rows = min(MAX_TILE_ROWS, _round_up(rows, rmult))

    num_blocks = int(pl.cdiv(rows, tile_rows))
    num_cores = min(NUM_CORES, num_blocks)
    blocks_per_core = int(pl.cdiv(num_blocks, num_cores))
    # Mask needed iff the core x block grid over-covers the true row extent.
    apply_mask = (num_cores * blocks_per_core * tile_rows) != rows

    # Accumulator width: up to 4 interleaved (8,128) partial vregs.
    acc_rows = 32 if tile_rows % 32 == 0 else (16 if tile_rows % 16 == 0 else 8)

    def in_idx(c, i):
        # Clamp so that fully-out-of-range grid steps (odd block counts split
        # over 2 cores) re-read the last valid block; the row mask zeroes
        # their contribution in-kernel.
        return (jnp.minimum(c * blocks_per_core + i, num_blocks - 1), 0)

    in_spec = pl.BlockSpec((tile_rows, LANES), in_idx)

    partials = pl.pallas_call(
        functools.partial(
            _focal_kernel,
            gamma=float(gamma),
            alpha=float(alpha),
            rows=int(rows),
            tile_rows=int(tile_rows),
            blocks_per_core=int(blocks_per_core),
            acc_rows=int(acc_rows),
            apply_mask=bool(apply_mask),
        ),
        out_shape=jax.ShapeDtypeStruct((num_cores, 1), jnp.float32),
        grid_spec=pltpu.PrefetchScalarGridSpec(
            num_scalar_prefetch=0,
            grid=(num_cores, blocks_per_core),
            in_specs=[in_spec, in_spec],
            out_specs=pl.BlockSpec((1, 1), lambda c, i: (c, 0),
                                   memory_space=pltpu.SMEM),
            scratch_shapes=[pltpu.VMEM((acc_rows, LANES), jnp.float32)],
        ),
        compiler_params=pltpu.CompilerParams(
            dimension_semantics=("parallel", "arbitrary"),
            vmem_limit_bytes=32 << 20),
    )(pred2d, gt2d)

    total = jnp.sum(partials)
    if mean:
        return total / jnp.float32(n_valid)
    return total


def _reference(pred, gt, mean, gamma=2.0, alpha=0.75):
    pred = pred.astype(jnp.float32)
    pos = (gt != 0).astype(jnp.float32)
    tisone = -(alpha * pos) * (1.0 - pred) ** gamma * jnp.log(pred)
    tiszero = -((1.0 - alpha) * (1.0 - pos)) * pred ** gamma * jnp.log(1.0 - pred)
    l = tisone + tiszero
    return jnp.mean(l) if mean else jnp.sum(l)


if __name__ == "__main__":
    key = jax.random.PRNGKey(0)
    k1, k2 = jax.random.split(key)

    # NCHW inputs, small shapes
    x_shape = (2, 4, 16, 16)
    pred = jax.nn.sigmoid(jax.random.normal(k1, x_shape, jnp.float32))  # in (0,1)
    gt = (jax.random.uniform(k2, x_shape) > 0.7).astype(jnp.float32)    # 0/1 labels

    out_mean = jax.block_until_ready(focal_loss(pred, gt, mean=True))
    out_sum = jax.block_until_ready(focal_loss(pred, gt, mean=False))

    ref_mean = _reference(pred, gt, True)
    ref_sum = _reference(pred, gt, False)

    assert jnp.allclose(out_mean, ref_mean, rtol=1e-5, atol=1e-5), (out_mean, ref_mean)
    assert jnp.allclose(out_sum, ref_sum, rtol=1e-5, atol=1e-4), (out_sum, ref_sum)

    # Ragged size (exercises the lane padding + in-kernel row-mask path).
    k3, k4 = jax.random.split(k1)
    y_shape = (3, 5, 7, 11)  # 1155 elements, not a multiple of 128
    pred2 = jax.nn.sigmoid(jax.random.normal(k3, y_shape, jnp.float32))
    gt2 = (jax.random.uniform(k4, y_shape) > 0.6).astype(jnp.float32)
    out2 = jax.block_until_ready(focal_loss(pred2, gt2, mean=True))
    ref2 = _reference(pred2, gt2, True)
    assert jnp.allclose(out2, ref2, rtol=1e-5, atol=1e-5), (out2, ref2)

    # Narrow-dtype path: bf16 pred + int8 gt streamed without a wrapper cast.
    k5, k6 = jax.random.split(k2)
    z_shape = (2, 4, 32, 16)  # 4096 elements
    pred3 = jax.nn.sigmoid(jax.random.normal(k5, z_shape, jnp.float32)).astype(jnp.bfloat16)
    gt3 = (jax.random.uniform(k6, z_shape) > 0.7).astype(jnp.int8)
    out3 = jax.block_until_ready(focal_loss(pred3, gt3, mean=True))
    ref3 = _reference(pred3.astype(jnp.float32), gt3.astype(jnp.float32), True)
    assert jnp.allclose(out3, ref3, rtol=1e-5, atol=1e-5), (out3, ref3)

    print("KERNEL_OK")
</pallas_src>

<mosaic_0001>
module attributes {stable_mosaic.version = 11 : i64} {
  func.func @_focal_kernel(%arg0: i32, %arg1: i32, %arg2: memref<16x128xf32, #tpu.memory_space<vmem>>, %arg3: memref<16x128xf32, #tpu.memory_space<vmem>>, %arg4: memref<1x1xf32, #tpu.memory_space<smem>>, %arg5: memref<16x128xf32, #tpu.memory_space<vmem>>) attributes {dimension_semantics = [#tpu.dimension_semantics<parallel>, #tpu.dimension_semantics<arbitrary>], iteration_bounds = array<i64: 1, 1>, scalar_prefetch = 0 : i64, scratch_operands = 1 : i64, tpu.core_type = #tpu.core_type<tc>, window_params = [{transform_indices = @transform_0, window_bounds = array<i64: 16, 128>}, {transform_indices = @transform_1, window_bounds = array<i64: 16, 128>}, {transform_indices = @transform_2, window_bounds = array<i64: 1, 1>}]} {
    %c0_i32 = arith.constant 0 : i32
    %0 = arith.cmpi eq, %arg1, %c0_i32 : i32
    %1 = arith.extui %0 : i1 to i32
    %c0_i32_0 = arith.constant 0 : i32
    %2 = arith.cmpi ne, %1, %c0_i32_0 : i32
    scf.if %2 {
      %cst_14 = arith.constant 0.000000e+00 : f32
      %26 = vector.broadcast %cst_14 : f32 to vector<16x128xf32>
      %c0_15 = arith.constant 0 : index
      %c0_16 = arith.constant 0 : index
      %27 = vector.load %arg5[%c0_15, %c0_16] : memref<16x128xf32, #tpu.memory_space<vmem>>, vector<16x128xf32>
      tpu.vector_store %arg5[%c0_15, %c0_16], %26 {strides = array<i32>} : memref<16x128xf32, #tpu.memory_space<vmem>>, vector<16x128xf32>,
    } else {
    }
    %c0 = arith.constant 0 : index
    %c0_1 = arith.constant 0 : index
    %3 = vector.load %arg2[%c0, %c0_1] : memref<16x128xf32, #tpu.memory_space<vmem>>, vector<16x128xf32>
    %c0_2 = arith.constant 0 : index
    %c0_3 = arith.constant 0 : index
    %4 = vector.load %arg3[%c0_2, %c0_3] : memref<16x128xf32, #tpu.memory_space<vmem>>, vector<16x128xf32>
    %cst = arith.constant 1.000000e+00 : f32
    %5 = vector.broadcast %cst : f32 to vector<16x128xf32>
    %6 = arith.subf %5, %3 : vector<16x128xf32>
    %cst_4 = arith.constant 0.000000e+00 : f32
    %7 = vector.broadcast %cst_4 : f32 to vector<16x128xf32>
    %8 = arith.cmpf one, %4, %7 : vector<16x128xf32>
    %9 = arith.select %8, %6, %3 : vector<16x128xi1>, vector<16x128xf32>
    %10 = arith.mulf %9, %9 : vector<16x128xf32>
    %cst_5 = arith.constant -7.500000e-01 : f32
    %cst_6 = arith.constant -2.500000e-01 : f32
    %11 = vector.broadcast %cst_5 : f32 to vector<16x128xf32>
    %12 = vector.broadcast %cst_6 : f32 to vector<16x128xf32>
    %13 = arith.select %8, %11, %12 : vector<16x128xi1>, vector<16x128xf32>
    %14 = arith.select %8, %3, %6 : vector<16x128xi1>, vector<16x128xf32>
    %15 = arith.mulf %13, %10 : vector<16x128xf32>
    %16 = math.log %14 : vector<16x128xf32>
    %17 = arith.mulf %15, %16 : vector<16x128xf32>
    %c0_7 = arith.constant 0 : index
    %c0_8 = arith.constant 0 : index
    %18 = vector.load %arg5[%c0_7, %c0_8] : memref<16x128xf32, #tpu.memory_space<vmem>>, vector<16x128xf32>
    %19 = vector.shape_cast %17 : vector<16x128xf32> to vector<1x16x128xf32>
    %cst_9 = arith.constant dense<0.000000e+00> : vector<16x128xf32>
    %20 = vector.multi_reduction <add>, %19, %cst_9 [0] : vector<1x16x128xf32> to vector<16x128xf32>
    %21 = arith.addf %18, %20 : vector<16x128xf32>
    %c0_10 = arith.constant 0 : index
    %c0_11 = arith.constant 0 : index
    %22 = vector.load %arg5[%c0_10, %c0_11] : memref<16x128xf32, #tpu.memory_space<vmem>>, vector<16x128xf32>
    tpu.vector_store %arg5[%c0_10, %c0_11], %21 {strides = array<i32>} : memref<16x128xf32, #tpu.memory_space<vmem>>, vector<16x128xf32>,
    %c0_i32_12 = arith.constant 0 : i32
    %23 = arith.cmpi eq, %arg1, %c0_i32_12 : i32
    %24 = arith.extui %23 : i1 to i32
    %c0_i32_13 = arith.constant 0 : i32
    %25 = arith.cmpi ne, %24, %c0_i32_13 : i32
    scf.if %25 {
      %c0_14 = arith.constant 0 : index
      %c0_15 = arith.constant 0 : index
      %26 = vector.load %arg5[%c0_14, %c0_15] : memref<16x128xf32, #tpu.memory_space<vmem>>, vector<16x128xf32>
      %27 = vector.shape_cast %26 : vector<16x128xf32> to vector<1x16x128xf32>
      %cst_16 = arith.constant dense<0.000000e+00> : vector<1xf32>
      %28 = vector.multi_reduction <add>, %27, %cst_16 [1, 2] : vector<1x16x128xf32> to vector<1xf32>
      %29 = vector.shape_cast %28 : vector<1xf32> to vector<1x1x1xf32>
      %30 = vector.extract %29[0, 0, 0] : f32 from vector<1x1x1xf32>
      %c0_17 = arith.constant 0 : index
      %c0_18 = arith.constant 0 : index
      %31 = memref.load %arg4[%c0_17, %c0_18] : memref<1x1xf32, #tpu.memory_space<smem>>
      memref.store %30, %arg4[%c0_17, %c0_18] : memref<1x1xf32, #tpu.memory_space<smem>>
    } else {
    }
    return
  }
  func.func @transform_0(%arg0: i32, %arg1: i32) -> (i32, i32) {
    %c1_i32 = arith.constant 1 : i32
    %0 = arith.muli %arg0, %c1_i32 : i32
    %1 = arith.addi %0, %arg1 : i32
    %c0_i32 = arith.constant 0 : i32
    %2 = arith.minsi %1, %c0_i32 : i32
    %c0_i32_0 = arith.constant 0 : i32
    %c0_i32_1 = arith.constant 0 : i32
    return %2, %c0_i32_0 : i32, i32
  }
  func.func @transform_1(%arg0: i32, %arg1: i32) -> (i32, i32) {
    %c1_i32 = arith.constant 1 : i32
    %0 = arith.muli %arg0, %c1_i32 : i32
    %1 = arith.addi %0, %arg1 : i32
    %c0_i32 = arith.constant 0 : i32
    %2 = arith.minsi %1, %c0_i32 : i32
    %c0_i32_0 = arith.constant 0 : i32
    %c0_i32_1 = arith.constant 0 : i32
    return %2, %c0_i32_0 : i32, i32
  }
  func.func @transform_2(%arg0: i32, %arg1: i32) -> (i32, i32) {
    %c0_i32 = arith.constant 0 : i32
    %c0_i32_0 = arith.constant 0 : i32
    return %arg0, %c0_i32 : i32, i32
  }
}

</mosaic_0001>

<bundles_post_ra>
// kernel: tpu_custom_call.1
= control target key start
LH: loop header
LB: loop body
LE: loop exit
PB: predicated region body
PF: predicated region fallthrough
CT: control target
= control target key end

     0   :  { %7 = vsyncpa [#allocation4], 0  ;;  %s230_s0 = inlined_call_operand.hbm [shape: f32[16,128], index: 0, kind: input, shape index: {}]   ;;  %s231_s1 = inlined_call_operand.hbm [shape: f32[16,128], index: 1, kind: input, shape index: {}]   ;;  %s232_s2 = inlined_call_operand.hbm [shape: f32[1,1], index: 2, kind: output, shape index: {}]  }
   0x1   :  { %8 = vsyncpa [#allocation7], 0 }
   0x2   :  { %9 = vsyncpa [#allocation5], 0  ;;  %s200_s9 = smov [#allocation3]  }
   0x3   :  { %s21_s10 = sshll.u32 %s200_s9, 4  ;;  %s22_s10 = int_to_ptr.vmem [resolvable:$true] %s21_s10 }
   0x4   :  { %s154_s11 = scalar_lea.vmem %s22_s10, 256  ;;  %p159_p1 = scmp.lt.s32.totalorder %s22_s10, %s22_s10 }
   0x5   :  { %p155_p0 = scmp.ne.s32.totalorder %s22_s10, %s154_s11  ;;  %p160_p2 = scmp.lt.s32.totalorder %s154_s11, %s154_s11 }
   0x7   :  { %p161_p3 = por %p160_p2, %p159_p1 }
   0x9   :  { %p162_p4 = pnand %p161_p3, %p155_p0 }
   0xb   :  { %165 = shalt.err (!%p162_p4)
}
   0xc   :  { %s201_s12 = smov 128   ;;  %s202_s13 = smov 8  }
   0xd   :  { %27 = dma.hbm_to_vmem [thread:$0]  %s230_s0, 256, %s22_s10, [#allocation4], %s201_s12, %s201_s12, %s202_s13  }
   0xe   :  { %s203_s16 = smov [#allocation6]  }
   0xf   :  { %s39_s17 = sshll.u32 %s203_s16, 4  ;;  %s40_s17 = int_to_ptr.vmem [resolvable:$true] %s39_s17 }
  0x10   :  { %s174_s18 = scalar_lea.vmem %s40_s17, 256  ;;  %p179_p6 = scmp.lt.s32.totalorder %s40_s17, %s40_s17 }
  0x11   :  { %p175_p5 = scmp.ne.s32.totalorder %s40_s17, %s174_s18  ;;  %p180_p7 = scmp.lt.s32.totalorder %s174_s18, %s174_s18 }
  0x13   :  { %p181_p8 = por %p180_p7, %p179_p6 }
  0x15   :  { %p182_p9 = pnand %p181_p8, %p175_p5 }
  0x17   :  { %185 = shalt.err (!%p182_p9)
}
  0x18   :  { %45 = dma.hbm_to_vmem [thread:$0]  %s231_s1, 256, %s40_s17, [#allocation7], %s201_s12, %s201_s12, %s202_s13  }
  0x19   :  { %194 = dma.done.wait [#allocation4], 256  }
  0x1a   :  { %195 = vsyncadd [#allocation4], 4294967040 }
  0x1b   :  { %196 = dma.done.wait [#allocation7], 256  }
  0x1c   :  { %197 = vsyncadd [#allocation7], 4294967040  ;;  %v66_v0 = vld [vmem:[#allocation3] sm:$0xff]  ;;  %v67_v1 = vld [vmem:[#allocation3 + $0x8] sm:$0xff]  ;;  %v204_v12 = vmov -0.25   ;;  %s205_s1 = smov [#allocation8]  }
  0x1d   :  { %v68_v2 = vld [vmem:[#allocation6] sm:$0xff]  ;;  %v69_v3 = vld [vmem:[#allocation6 + $0x8] sm:$0xff]  ;;  %v70_v4 = vsub.f32 1.0, %v66_v0  ;;  %v71_v5 = vsub.f32 1.0, %v67_v1 }
  0x1e   :  { %vm72_vm0 = vcmp.ne.f32.partialorder %v68_v2, 0.0  ;;  %vm73_vm1 = vcmp.ne.f32.partialorder %v69_v3, 0.0 }
  0x1f   :  { %v80_v6 = vsel %vm72_vm0, %v66_v0, %v70_v4  ;;  %v81_v7 = vsel %vm73_vm1, %v67_v1, %v71_v5  ;;  %v74_v8 = vsel %vm72_vm0, %v70_v4, %v66_v0  ;;  %v75_v9 = vsel %vm73_vm1, %v71_v5, %v67_v1 }
  0x20   :  { %142 = vlog2.f32 %v80_v6  ;;  %v76_v10 = vmul.f32 %v74_v8, %v74_v8  ;;  %v77_v11 = vmul.f32 %v75_v9, %v75_v9  ;;  %v78_v13 = vsel %vm72_vm0, -0.75, %v204_v12 }
  0x21   :  { %144 = vlog2.f32 %v81_v7  ;;  %v79_v14 = vsel %vm73_vm1, -0.75, %v204_v12 }
  0x22   :  { %v82_v15 = vmul.f32 %v78_v13, %v76_v10  ;;  %v83_v17 = vmul.f32 %v79_v14, %v77_v11 }
  0x2d   :  { %v143_v16 = vpop.eup %142 }
  0x2e   :  { %v145_v18 = vpop.eup %144  ;;  %v85_v19 = vmul.f32 0.6931472, %v143_v16 }
  0x2f   :  { %v87_v20 = vmul.f32 0.6931472, %v145_v18 }
  0x30   :  { %v88_v21 = vmul.f32 %v85_v19, %v82_v15 }
  0x31   :  { %v89_v22 = vmul.f32 %v87_v20, %v83_v17 }
  0x33   :  { %v103_v23 = vadd.f32 %v89_v22, %v88_v21 }
  0x35   :  { %104 = vadd.xlane.f32.xlu0 %v103_v23 }
  0xbe   :  { %v105_v24 = vpop.xlane.xlu0 %104 }
  0xbf   :  { %v106_v25 = vrot.slane %v105_v24, 4 }
  0xc1   :  { %v107_v26 = vadd.f32 %v106_v25, %v105_v24 }
  0xc3   :  { %v108_v27 = vrot.slane %v107_v26, 2 }
  0xc5   :  { %v109_v28 = vadd.f32 %v108_v27, %v107_v26 }
  0xc7   :  { %v110_v29 = vrot.slane %v109_v28, 1 }
  0xc9   :  { %v111_v30 = vadd.f32 %v110_v29, %v109_v28 }
  0xcb   :  { %134 = vpush %v111_v30 }
  0xfc   :  { %s135_s0 = spop %134 }
  0xfd   :  { %114 = sst [smem:[#allocation8]] %s135_s0 }
  0xfe   :  { %122 = dma.smem_to_hbm %s205_s1, 16, %s232_s2, [#allocation5]  }
  0xff   :  { %198 = dma.done.wait [#allocation5], 16  }
 0x100   :  { %199 = vsyncadd [#allocation5], 4294967280 }
 0x101   :  { %126 = sfence }
 0x102   :  { %127 = vsyncpa [#allocation4], 1 }
 0x103   :  { %128 = vsyncpa [#allocation7], 1 }
 0x104   :  { %129 = vsyncpa [#allocation5], 1 }

</bundles_post_ra>
